<compile_context>
chip_gen: v7x
topology: tpu7x:2x2x1
jax: 0.10.0
libtpu: 0.0.40
codegen_flags: <defaults>
</compile_context>

<pallas_src>
import functools

import jax
import jax.numpy as jnp
from jax import lax
from jax.experimental import pallas as pl
from jax.experimental.pallas import tpu as pltpu


def _img_proj_kernel(x_ref, w_ref, b_ref, g_ref, beta_ref, o_ref, *, inv_dim, eps):
    # x_ref:    (bt, E)   compute dtype (bf16)   input embeddings tile
    # w_ref:    (E, D)    compute dtype (bf16)   weight columns for this token
    # b_ref:    (1, D)    f32                    bias slice for this token
    # g_ref:    (1, D)    f32                    LayerNorm gamma
    # beta_ref: (1, D)    f32                    LayerNorm beta
    # o_ref:    (bt, D)                          output tile

    # Linear: MXU matmul, f32 accumulation.
    y = jnp.dot(x_ref[...], w_ref[...], preferred_element_type=jnp.float32)
    y = y + b_ref[...]

    # LayerNorm over D (biased variance + eps, matching torch.nn.LayerNorm).
    # Multiply by precomputed 1/D instead of jnp.mean (saves VALU divides);
    # rsqrt lowers to the EUP slot.
    mean = jnp.sum(y, axis=-1, keepdims=True) * inv_dim
    yc = y - mean
    var = jnp.sum(yc * yc, axis=-1, keepdims=True) * inv_dim
    y_hat = yc * lax.rsqrt(var + eps)

    o_ref[...] = (y_hat * g_ref[...] + beta_ref[...]).astype(o_ref.dtype)


def image_proj_model(image_embeds, proj_w, proj_b, ln_gamma, ln_beta,
                     *, clip_extra_context_tokens, cross_attention_dim,
                     eps=1e-5, batch_tile=256, compute_dtype=jnp.bfloat16):
    """Pallas implementation of ImageProjModel.forward.

    image_embeds: (B, E)    f32
    proj_w:       (E, T*D)  PyTorch Linear weight transposed to (in, out)
    proj_b:       (T*D,)
    ln_gamma:     (D,)
    ln_beta:      (D,)
    returns:      (B, T, D) in image_embeds.dtype
    """
    B, E = image_embeds.shape
    T = clip_extra_context_tokens
    D = cross_attention_dim
    assert proj_w.shape == (E, T * D), (proj_w.shape, (E, T * D))
    assert D % 128 == 0, "cross_attention_dim must be a multiple of the 128-lane width"

    # Keep the whole (small) batch in every block; only tile batch if it is big.
    bt = B if B <= batch_tile else batch_tile
    nb = pl.cdiv(B, bt)

    # bf16 operands for the MXU; LayerNorm params stay f32.  The casts are
    # no-ops if the caller already stores parameters in compute_dtype (the
    # recommended setup for repeated inference calls).
    x = image_embeds if image_embeds.dtype == compute_dtype else image_embeds.astype(compute_dtype)
    w = proj_w if proj_w.dtype == compute_dtype else proj_w.astype(compute_dtype)
    b2 = proj_b.reshape(1, T * D).astype(jnp.float32)
    g2 = ln_gamma.reshape(1, D).astype(jnp.float32)
    beta2 = ln_beta.reshape(1, D).astype(jnp.float32)

    kernel = functools.partial(_img_proj_kernel, inv_dim=1.0 / D, eps=eps)

    out_dtype = image_embeds.dtype
    cost = pl.CostEstimate(
        flops=2 * B * E * T * D,
        transcendentals=B * T,
        bytes_accessed=(x.size * x.dtype.itemsize
                        + w.size * w.dtype.itemsize
                        + (T * D + 2 * D) * 4
                        + B * T * D * jnp.dtype(out_dtype).itemsize),
    )

    # Grid: token axis OUTER so each (E, D) weight block is fetched exactly
    # once and reused across all batch tiles; the tiny x tile is re-streamed.
    grid_spec = pltpu.PrefetchScalarGridSpec(
        num_scalar_prefetch=0,
        grid=(T, nb),
        in_specs=[
            pl.BlockSpec((bt, E), lambda t, i: (i, 0)),   # x tile (tiny)
            pl.BlockSpec((E, D), lambda t, i: (0, t)),    # weight columns for token t (streamed)
            pl.BlockSpec((1, D), lambda t, i: (0, t)),    # bias slice for token t
            pl.BlockSpec((1, D), lambda t, i: (0, 0)),    # gamma
            pl.BlockSpec((1, D), lambda t, i: (0, 0)),    # beta
        ],
        # Lane-dense 2D output slab (B, T*D), tiled (bt, D) per (token, batch).
        out_specs=pl.BlockSpec((bt, D), lambda t, i: (i, t)),
    )

    out2d = pl.pallas_call(
        kernel,
        out_shape=jax.ShapeDtypeStruct((B, T * D), out_dtype),
        grid_spec=grid_spec,
        compiler_params=pltpu.CompilerParams(
            dimension_semantics=("parallel", "parallel")),
        cost_estimate=cost,
    )(x, w, b2, g2, beta2)

    # Wrapper-side reshape to (B, T, D): pure layout plumbing, no in-kernel relayout.
    return out2d.reshape(B, T, D)


def _reference_f32(image_embeds, proj_w, proj_b, ln_gamma, ln_beta, T, D, eps=1e-5):
    y = jnp.dot(image_embeds, proj_w, preferred_element_type=jnp.float32) + proj_b
    y = y.reshape(-1, T, D)
    mean = jnp.mean(y, axis=-1, keepdims=True)
    var = jnp.mean((y - mean) ** 2, axis=-1, keepdims=True)
    return (y - mean) * lax.rsqrt(var + eps) * ln_gamma + ln_beta


if __name__ == "__main__":
    # Small shapes consistent with the module (scaled down from 1024/1024/4).
    B = 8                      # batch
    E = 128                    # clip_embeddings_dim
    D = 128                    # cross_attention_dim
    T = 4                      # clip_extra_context_tokens

    key = jax.random.PRNGKey(0)
    k_x, k_w, k_b, k_g, k_beta = jax.random.split(key, 5)

    image_embeds = jax.random.normal(k_x, (B, E), dtype=jnp.float32)
    # Deterministic synthetic parameters (Linear weight stored as (E, T*D)).
    proj_w = jax.random.normal(k_w, (E, T * D), dtype=jnp.float32) * (1.0 / jnp.sqrt(E))
    proj_b = jax.random.normal(k_b, (T * D,), dtype=jnp.float32) * 0.02
    ln_gamma = 1.0 + 0.1 * jax.random.normal(k_g, (D,), dtype=jnp.float32)
    ln_beta = 0.1 * jax.random.normal(k_beta, (D,), dtype=jnp.float32)

    out = image_proj_model(
        image_embeds, proj_w, proj_b, ln_gamma, ln_beta,
        clip_extra_context_tokens=T, cross_attention_dim=D)
    out = jax.block_until_ready(out)

    assert out.shape == (B, T, D)

    # Tight check vs a reference using the same bf16 operands (tests kernel structure).
    ref_bf16 = _reference_f32(
        image_embeds.astype(jnp.bfloat16).astype(jnp.float32),
        proj_w.astype(jnp.bfloat16).astype(jnp.float32),
        proj_b, ln_gamma, ln_beta, T, D)
    assert jnp.allclose(out, ref_bf16, rtol=1e-2, atol=1e-2), "mismatch vs bf16 reference"

    # Loose check vs the full-f32 reference (bf16 weight quantization only).
    ref_f32 = _reference_f32(image_embeds, proj_w, proj_b, ln_gamma, ln_beta, T, D)
    assert jnp.allclose(out, ref_f32, rtol=5e-2, atol=5e-2), "mismatch vs f32 reference"

    print("KERNEL_OK")
</pallas_src>

<mosaic_0001>
module attributes {stable_mosaic.version = 11 : i64} {
  func.func @_img_proj_kernel(%arg0: i32, %arg1: i32, %arg2: memref<8x128xbf16, #tpu.memory_space<vmem>>, %arg3: memref<128x128xbf16, #tpu.memory_space<vmem>>, %arg4: memref<1x128xf32, #tpu.memory_space<vmem>>, %arg5: memref<1x128xf32, #tpu.memory_space<vmem>>, %arg6: memref<1x128xf32, #tpu.memory_space<vmem>>, %arg7: memref<8x128xf32, #tpu.memory_space<vmem>>) attributes {dimension_semantics = [#tpu.dimension_semantics<parallel>, #tpu.dimension_semantics<parallel>], iteration_bounds = array<i64: 4, 1>, scalar_prefetch = 0 : i64, scratch_operands = 0 : i64, tpu.core_type = #tpu.core_type<tc>, window_params = [{transform_indices = @transform_0, window_bounds = array<i64: 8, 128>}, {transform_indices = @transform_1, window_bounds = array<i64: 128, 128>}, {transform_indices = @transform_2, window_bounds = array<i64: 1, 128>}, {pipeline_mode = #tpu.pipeline_mode<synchronous>, transform_indices = @transform_3, window_bounds = array<i64: 1, 128>}, {pipeline_mode = #tpu.pipeline_mode<synchronous>, transform_indices = @transform_4, window_bounds = array<i64: 1, 128>}, {transform_indices = @transform_5, window_bounds = array<i64: 8, 128>}]} {
    %c0 = arith.constant 0 : index
    %c0_0 = arith.constant 0 : index
    %0 = vector.load %arg2[%c0, %c0_0] : memref<8x128xbf16, #tpu.memory_space<vmem>>, vector<8x128xbf16>
    %c0_1 = arith.constant 0 : index
    %c0_2 = arith.constant 0 : index
    %1 = vector.load %arg3[%c0_1, %c0_2] : memref<128x128xbf16, #tpu.memory_space<vmem>>, vector<128x128xbf16>
    %cst = arith.constant dense<0.000000e+00> : vector<8x128xf32>
    %2 = tpu.matmul %0, %1, %cst {dimension_numbers = #tpu.dot_dimension_numbers<[1], [0], [0], [1], [0, 0, 1, 1], [], []>} : vector<8x128xbf16>, vector<128x128xbf16>, vector<8x128xf32> -> vector<8x128xf32>
    %c0_3 = arith.constant 0 : index
    %c0_4 = arith.constant 0 : index
    %3 = vector.load %arg4[%c0_3, %c0_4] : memref<1x128xf32, #tpu.memory_space<vmem>>, vector<1x128xf32>
    %4 = vector.broadcast %3 : vector<1x128xf32> to vector<8x128xf32>
    %5 = arith.addf %2, %4 : vector<8x128xf32>
    %cst_5 = arith.constant dense<0.000000e+00> : vector<8xf32>
    %6 = vector.multi_reduction <add>, %5, %cst_5 [1] : vector<8x128xf32> to vector<8xf32>
    %7 = vector.shape_cast %6 : vector<8xf32> to vector<8x1xf32>
    %cst_6 = arith.constant 7.812500e-03 : f32
    %8 = vector.broadcast %cst_6 : f32 to vector<8x1xf32>
    %9 = arith.mulf %7, %8 : vector<8x1xf32>
    %10 = vector.broadcast %9 : vector<8x1xf32> to vector<8x128xf32>
    %11 = arith.subf %5, %10 : vector<8x128xf32>
    %12 = arith.mulf %11, %11 : vector<8x128xf32>
    %cst_7 = arith.constant dense<0.000000e+00> : vector<8xf32>
    %13 = vector.multi_reduction <add>, %12, %cst_7 [1] : vector<8x128xf32> to vector<8xf32>
    %14 = vector.shape_cast %13 : vector<8xf32> to vector<8x1xf32>
    %cst_8 = arith.constant 7.812500e-03 : f32
    %15 = vector.broadcast %cst_8 : f32 to vector<8x1xf32>
    %16 = arith.mulf %14, %15 : vector<8x1xf32>
    %cst_9 = arith.constant 9.99999974E-6 : f32
    %17 = vector.broadcast %cst_9 : f32 to vector<8x1xf32>
    %18 = arith.addf %16, %17 : vector<8x1xf32>
    %19 = math.rsqrt %18 : vector<8x1xf32>
    %20 = vector.broadcast %19 : vector<8x1xf32> to vector<8x128xf32>
    %21 = arith.mulf %11, %20 : vector<8x128xf32>
    %c0_10 = arith.constant 0 : index
    %c0_11 = arith.constant 0 : index
    %22 = vector.load %arg5[%c0_10, %c0_11] : memref<1x128xf32, #tpu.memory_space<vmem>>, vector<1x128xf32>
    %23 = vector.broadcast %22 : vector<1x128xf32> to vector<8x128xf32>
    %24 = arith.mulf %21, %23 : vector<8x128xf32>
    %c0_12 = arith.constant 0 : index
    %c0_13 = arith.constant 0 : index
    %25 = vector.load %arg6[%c0_12, %c0_13] : memref<1x128xf32, #tpu.memory_space<vmem>>, vector<1x128xf32>
    %26 = vector.broadcast %25 : vector<1x128xf32> to vector<8x128xf32>
    %27 = arith.addf %24, %26 : vector<8x128xf32>
    %c0_14 = arith.constant 0 : index
    %c0_15 = arith.constant 0 : index
    %28 = vector.load %arg7[%c0_14, %c0_15] : memref<8x128xf32, #tpu.memory_space<vmem>>, vector<8x128xf32>
    tpu.vector_store %arg7[%c0_14, %c0_15], %27 {strides = array<i32>} : memref<8x128xf32, #tpu.memory_space<vmem>>, vector<8x128xf32>,
    return
  }
  func.func @transform_0(%arg0: i32, %arg1: i32) -> (i32, i32) {
    %c0_i32 = arith.constant 0 : i32
    %c0_i32_0 = arith.constant 0 : i32
    return %arg1, %c0_i32 : i32, i32
  }
  func.func @transform_1(%arg0: i32, %arg1: i32) -> (i32, i32) {
    %c0_i32 = arith.constant 0 : i32
    %c0_i32_0 = arith.constant 0 : i32
    return %c0_i32, %arg0 : i32, i32
  }
  func.func @transform_2(%arg0: i32, %arg1: i32) -> (i32, i32) {
    %c0_i32 = arith.constant 0 : i32
    %c0_i32_0 = arith.constant 0 : i32
    return %c0_i32, %arg0 : i32, i32
  }
  func.func @transform_3(%arg0: i32, %arg1: i32) -> (i32, i32) {
    %c0_i32 = arith.constant 0 : i32
    %c0_i32_0 = arith.constant 0 : i32
    %c0_i32_1 = arith.constant 0 : i32
    return %c0_i32, %c0_i32_0 : i32, i32
  }
  func.func @transform_4(%arg0: i32, %arg1: i32) -> (i32, i32) {
    %c0_i32 = arith.constant 0 : i32
    %c0_i32_0 = arith.constant 0 : i32
    %c0_i32_1 = arith.constant 0 : i32
    return %c0_i32, %c0_i32_0 : i32, i32
  }
  func.func @transform_5(%arg0: i32, %arg1: i32) -> (i32, i32) {
    %c0_i32 = arith.constant 0 : i32
    return %arg1, %arg0 : i32, i32
  }
}

</mosaic_0001>

<bundles_post_ra>
// kernel: tpu_custom_call.1
= control target key start
LH: loop header
LB: loop body
LE: loop exit
PB: predicated region body
PF: predicated region fallthrough
CT: control target
= control target key end

     0   :  { %10 = vsyncpa [#allocation3], 0  ;;  %s1106_s0 = inlined_call_operand.hbm [shape: bf16[8,128], index: 0, kind: input, shape index: {}]   ;;  %s1107_s1 = inlined_call_operand.hbm [shape: bf16[128,512], index: 1, kind: input, shape index: {}]   ;;  %s1108_s2 = inlined_call_operand.vmem [shape: f32[1,512], index: 2, kind: input, shape index: {}]   ;;  %s1109_s3 = inlined_call_operand.vmem [shape: f32[1,128], index: 3, kind: input, shape index: {}]   ;;  %s1110_s4 = inlined_call_operand.vmem [shape: f32[1,128], index: 4, kind: input, shape index: {}]   ;;  %s1111_s5 = inlined_call_operand.hbm [shape: f32[8,512], index: 5, kind: output, shape index: {}]  }
   0x1   :  { %11 = vsyncpa [#allocation6], 0 }
   0x2   :  { %13 = vsyncpa [#allocation6 + $0x1], 0 }
   0x3   :  { %14 = vsyncpa [#allocation4], 0 }
   0x4   :  { %16 = vsyncpa [#allocation4 + $0x1], 0  ;;  %s877_s18 = smov 0   ;;  %s879_s19 = smov 0  }
   0x5   :  { %s881_s20 = smov 0   ;;  %s883_s21 = smov 0  }
   0x6   :  { %s885_s22 = smov 0   ;;  %s887_s23 = smov 0  }
   0x7 LB: > { %s550_s24 = sadd.s32 4294967295, %s837_s23   ;;  %s551_s25 = sadd.s32 4294967294, %s837_s23   ;;  %s837_s23 = sphi %s887_s23, %s22_s23   ;;  %s833_s22 = sphi %s885_s22, %s1139_s22   ;;  %s829_s21 = sphi %s883_s21, %s1138_s21   ;;  %s825_s20 = sphi %s881_s20, %s1137_s20   ;;  %s821_s19 = sphi %s879_s19, %s1136_s19   ;;  %s817_s18 = sphi %s877_s18, %s1135_s18  }
   0x8   : > { %p74_p0 = scmp.ne.s32.totalorder %s825_s20, %s821_s19  ;;  %p75_p1 = scmp.eq.s32.totalorder %s837_s23, 0 }
   0x9   : > { %p80_p2 = scmp.ne.s32.totalorder %s821_s19, %s817_s18  ;;  %p915_p3 = scmp.eq.s32.totalorder %s550_s24, 0 }
   0xa   : > { %p174_p4 = scmp.eq.s32.totalorder %s550_s24, 3  ;;  %p919_p5 = por %p75_p1, %p74_p0 }
   0xb   : > { %s1118_s27 = scalar_select %p915_p3, 1, 0 }
   0xc   : > { %p180_p6 = scmp.eq.s32.totalorder %s551_s25, 3  ;;  %p925_p7 = por %p915_p3, %p80_p2 }
   0xd   : > { %p929_p8 = por %p174_p4, %p74_p0  ;;  %p552_p10 = scmp.ge.s32.totalorder %s837_s23, 1 }
   0xe   : > { %s1120_s29 = scalar_select %p925_p7, 1, 0 }
   0xf   : > { %s1121_s30 = scalar_select %p929_p8, 1, 0 }
  0x10   : > { %p933_p9 = por %p180_p6, %p80_p2  ;;  %p187_p11 = scmp.lt.s32.totalorder %s837_s23, 5 }
  0x11   : > { %s839_s8 = smov [#allocation2]   ;;  %p626_p13 = scmp.lt.s32.totalorder %s837_s23, 4 }
  0x12   : > { %s1122_s6 = scalar_select %p933_p9, 1, 0 }
  0x13   : > { %p939_p12 = pnand %p552_p10, %p187_p11  ;;  %s202_s9 = sshll.u32 %s839_s8, 4  ;;  %s203_s9 = int_to_ptr.vmem [resolvable:$true] %s202_s9 }
  0x14   : > { %p948_p1 = pnand %p626_p13, %p919_p5  ;;  %s34_s12 = sadd.s32 1, %s833_s22 }
  0x15   : > { %s1123_s7 = scalar_select %p939_p12, 1, 0 }
  0x16   : > { %p613_p0 = pneg %p939_p12  ;;  %p959_p4 = scmp.ge.s32.totalorder %s34_s12, 4 }
  0x17   : > { %s1124_s10 = scalar_select %p948_p1, 1, 0 }
  0x18   : > { %p954_p2 = pnand %p613_p0, %p915_p3  ;;  %s219_s14 = sand.u32 1, %s825_s20  }
  0x19   : > { %s1126_s13 = scalar_select %p959_p4, 1, 0 }
  0x1a   : > { %s693_s17 = scalar_lea.hbm %s1106_s0, 64  ;;  %p695_p6 = pneg %p954_p2 }
  0x1b   : > { %p694_p5 = scmp.ne.s32.totalorder %s1106_s0, %s693_s17  ;;  %p700_p13 = scmp.lt.u32.totalorder %s693_s17, %s1106_s0 }
  0x1d   : > { %p696_p10 = pnand %p695_p6, %p694_p5 }
  0x1f   : > { %p697_p11 = pneg %p696_p10 }
  0x21   : > { %p702_p0 = pnand %p700_p13, %p697_p11 }
  0x23   : > { %705 = shalt.err (!%p702_p0)
}
  0x24   : > { %s706_s26 = scalar_lea.vmem %s203_s9, 64  ;;  %p714_p3 = scmp.lt.s32.totalorder %s203_s9, %s203_s9 }
  0x25   : > { %p707_p9 = scmp.ne.s32.totalorder %s203_s9, %s706_s26  ;;  %p715_p12 = scmp.lt.s32.totalorder %s706_s26, %s706_s26 }
  0x27   : > { %p709_p8 = pnand %p707_p9, %p695_p6  ;;  %p716_p1 = por %p715_p12, %p714_p3 }
  0x29   : > { %p710_p7 = pneg %p709_p8 }
  0x2b   : > { %p717_p4 = pnand %p716_p1, %p710_p7 }
  0x2d   : > { %720 = shalt.err (!%p717_p4)
}
  0x2e   : > { %616 = dma.hbm_to_vmem [thread:$0]  (!%p954_p2), %s1106_s0, 64, %s203_s9, [#allocation3]  }
  0x2f   : > { %p1127_p9 = scmp.ne.s32.totalorder %s1126_s13, 0  ;;  %s555_s26 = sshll.u32 %s219_s14, 6 }
  0x30   : > { %s556_s24 = sshll.u32 %s833_s22, 6  ;;  %s223_s8 = scalar_lea.vmem [#allocation5], %s555_s26 }
  0x31   : > { %s1141_s12 = smov (%p1127_p9, %s34_s12), 0  ;;  %s990_s28 = scalar_lea.hbm %s1107_s1, %s556_s24 }
  0x32   : > { %s64_s17 = ssub.s32 %s833_s22, %s1141_s12  ;;  %s229_s15 = sshll.u32 %s223_s8, 4  ;;  %s997_s15 = int_to_ptr.vmem [resolvable:$true] %s229_s15 }
  0x33   : > { %p65_p3 = scmp.eq.s32.totalorder %s64_s17, 0  ;;  %s1128_s9 = sadd.s32 1, %s825_s20 }
  0x34   : > { %s999_s16 = scalar_lea.sflag [#allocation6], %s219_s14  ;;  %s721_s17 = scalar_lea.hbm %s990_s28, 1024 }
  0x35   : > { %s995_s13 = scalar_select %p65_p3, %s825_s20, %s1128_s9  }
  0x36   : > { %p722_p7 = scmp.ne.s32.totalorder %s990_s28, %s721_s17  ;;  %p1129_p8 = scmp.ne.s32.totalorder %s1124_s10, 0 }
  0x37   : > { %s726_s26 = scalar_lea.hbm %s1107_s1, 4096  ;;  %p727_p4 = scmp.lt.u32.totalorder %s990_s28, %s1107_s1 }
  0x38   : > { %p723_p12 = pneg %p1129_p8  ;;  %p728_p5 = scmp.lt.u32.totalorder %s726_s26, %s721_s17 }
  0x39   : > { %p730_p10 = scmp.lt.u32.totalorder %s721_s17, %s990_s28 }
  0x3a   : > { %p724_p1 = pnand %p723_p12, %p722_p7  ;;  %p729_p6 = por %p728_p5, %p727_p4 }
  0x3c   : > { %p725_p2 = pneg %p724_p1  ;;  %p731_p11 = por %p730_p10, %p729_p6 }
  0x3e   : > { %p732_p13 = pnand %p731_p11, %p725_p2 }
  0x40   : > { %735 = shalt.err (!%p732_p13)
}
  0x41   : > { %s736_s14 = scalar_lea.vmem %s997_s15, 1024  ;;  %s840_s9 = smov [#allocation5]  }
  0x42   : > { %p737_p0 = scmp.ne.s32.totalorder %s997_s15, %s736_s14  ;;  %s741_s24 = sshll.u32 %s840_s9, 4  ;;  %s742_s24 = int_to_ptr.vmem [resolvable:$false] %s741_s24 }
  0x43   : > { %s743_s11 = scalar_lea.vmem %s742_s24, 2048  ;;  %p744_p7 = scmp.lt.s32.totalorder %s997_s15, %s742_s24 }
  0x44   : > { %p739_p9 = pnand %p737_p0, %p723_p12  ;;  %p745_p1 = scmp.lt.s32.totalorder %s743_s11, %s736_s14 }
  0x46   : > { %p740_p3 = pneg %p739_p9  ;;  %p746_p4 = por %p745_p1, %p744_p7 }
  0x48   : > { %p747_p5 = pnand %p746_p4, %p740_p3 }
  0x4a   : > { %750 = shalt.err (!%p747_p5)
}
  0x4b   : > { %s841_s17 = smov 256   ;;  %s842_s26 = smov 64  }
  0x4c   : > { %s843_s25 = smov 4   ;;  %p1130_p12 = scmp.ne.s32.totalorder %s1123_s7, 0 }
  0x4d   : > { %620 = dma.hbm_to_vmem [thread:$0]  (!%p1129_p8), %s990_s28, 1024, %s997_s15, %s999_s16, %s841_s17, %s842_s26, %s843_s25  }
  0x4e   : > { %247 = sbr.rel (%p1130_p12) target bundleno = 662 (0x296), region = 40  ;;  %p1131_p2 = scmp.ne.s32.totalorder (!%p1130_p12), %s1118_s27, 0 }
  0x55   : > { %804 = dma.done.wait (%p1131_p2), [#allocation3], 64  }
  0x56   : > { %806 = vsyncadd (%p1131_p2), [#allocation3], 4294967232  ;;  %s1034_s8 = sand.u32 1, %s821_s19   ;;  %p1132_p6 = scmp.ne.s32.totalorder %s1120_s29, 0 }
  0x57   : > { %s559_s14 = sshll.u32 %s1034_s8, 6  ;;  %s254_s9 = scalar_lea.sflag [#allocation6], %s1034_s8 }
  0x58   : > { %s257_s24 = scalar_lea.vmem [#allocation5], %s559_s14 }
  0x59   : > { %808 = dma.done.wait (%p1132_p6), %s254_s9, 1024  }
  0x5a   : > { %810 = vsyncadd (%p1132_p6), %s254_s9, 4294966272  ;;  %v844_v0 = vmov 0.0   ;;  %vm845_vm0 = vmmov 0   ;;  %v683_v1 = vld [vmem:[%s257_s24] sm:$0xff]   ;;  %v684_v2 = vld [vmem:[%s257_s24 + $0x8] sm:$0xff]   ;;  %p287_p8 = scmp.lt.s32.totalorder %s829_s21, 3 }
  0x5b   : > { %585 = vmatprep.subr.bf16.mxu0 %v844_v0  ;;  %601 = vmatprep.mubr.msk.bf16.mxu0 %vm845_vm0, %v844_v0  ;;  %v685_v3 = vld [vmem:[%s257_s24 + $0x10] sm:$0xff]   ;;  %v686_v4 = vld [vmem:[%s257_s24 + $0x18] sm:$0xff]   ;;  %v687_v5 = vld [vmem:[%s257_s24 + $0x20] sm:$0xff]   ;;  %s560_s28 = sshll.u32 %s1034_s8, 3  ;;  %s573_s26 = sshll.u32 %s829_s21, 7 }
  0x5c   : > { %586 = vmatpush3.bf16.msra.mxu0 %v683_v1  ;;  %v688_v6 = vld [vmem:[%s257_s24 + $0x28] sm:$0xff]   ;;  %v689_v7 = vld [vmem:[%s257_s24 + $0x30] sm:$0xff]   ;;  %v690_v8 = vld [vmem:[%s257_s24 + $0x38] sm:$0xff]   ;;  %s288_s27 = scalar_select %p287_p8, %s829_s21, 3 }
  0x5d   : > { %587 = vmatprep.subr.bf16.mxu0 %v844_v0  ;;  %v291_v9 = vld [vmem:[#allocation2] sm:$0xf]  ;;  %s286_s25 = scalar_lea.vmem [#allocation7], %s560_s28  ;;  %s432_s29 = scalar_lea.sflag [#allocation4], %s1034_s8 }
  0x5e   : > { %s289_s10 = scalar_lea.vmem %s1108_s2, %s288_s27  ;;  %v570_v24 = vld [vmem:[%s1109_s3] ss:$0 sm:$0xff]  ;;  %s447_s14 = sshll.u32 %s286_s25, 4  ;;  %s1060_s14 = int_to_ptr.vmem [resolvable:$true] %s447_s14 }
  0x5f   : > { %v561_v10 = vld [vmem:[%s289_s10] ss:$0 sm:$0xff]  ;;  %s1058_s27 = scalar_lea.hbm %s1111_s5, %s573_s26  ;;  %s751_s7 = scalar_lea.vmem %s1060_s14, 128 }
  0x60   : > { %588 = vmatpush3.bf16.msra.mxu0 %v684_v2  ;;  %v571_v26 = vld [vmem:[%s1110_s4] ss:$0 sm:$0xff]  ;;  %p752_p10 = scmp.ne.s32.totalorder %s1060_s14, %s751_s7  ;;  %p1133_p11 = scmp.ne.s32.totalorder %s1121_s30, 0 }
  0x61   : > { %589 = vmatprep.subr.bf16.mxu0 %v844_v0  ;;  %s846_s21 = smov [#allocation7]  }
  0x62   : > { %p753_p13 = pnand %p752_p10, %p1133_p11  ;;  %s755_s10 = sshll.u32 %s846_s21, 4  ;;  %s756_s10 = int_to_ptr.vmem [resolvable:$false] %s755_s10 }
  0x63   : > { %s757_s28 = scalar_lea.vmem %s756_s10, 256  ;;  %p758_p9 = scmp.lt.s32.totalorder %s1060_s14, %s756_s10 }
  0x64   : > { %590 = vmatpush3.bf16.msra.mxu0 %v685_v3  ;;  %p754_p0 = pneg %p753_p13  ;;  %p759_p3 = scmp.lt.s32.totalorder %s757_s28, %s751_s7 }
  0x65   : > { %591 = vmatprep.subr.bf16.mxu0 %v844_v0 }
  0x66   : > { %p760_p7 = por %p759_p3, %p758_p9 }
  0x68   : > { %592 = vmatpush3.bf16.msra.mxu0 %v686_v4  ;;  %p761_p1 = pnand %p760_p7, %p754_p0 }
  0x69   : > { %593 = vmatprep.subr.bf16.mxu0 %v844_v0 }
  0x6c   : > { %594 = vmatpush3.bf16.msra.mxu0 %v687_v5 }
  0x6d   : > { %595 = vmatprep.subr.bf16.mxu0 %v844_v0 }
  0x70   : > { %596 = vmatpush3.bf16.msra.mxu0 %v688_v6 }
  0x71   : > { %597 = vmatprep.subr.bf16.mxu0 %v844_v0 }
  0x74   : > { %598 = vmatpush3.bf16.msra.mxu0 %v689_v7 }
  0x75   : > { %599 = vmatprep.subr.bf16.mxu0 %v844_v0 }
  0x78   : > { %600 = vmatpush3.bf16.msra.mxu0 %v690_v8 }
  0x7b   : > { %602 = vmatmul.mubr.bf16.vlgmr.msra.gmra.mrb[0].mxu0 %v291_v9 }
 0x14e   : > { %v397_v11 = vpop.f32.mrb[0].mxu0 }
 0x14f   : > { %v398_v12 = vadd.f32 %v561_v10, %v397_v11  ;;  %v603_v13 = vpop.f32.mrb[1].mxu0 }
 0x150   : > { %v400_v14 = vpop.f32.mrb[2].mxu0 }
 0x151   : > { %403 = vadd.xlane.f32.xlu0 %v398_v12  ;;  %v604_v15 = vpop.f32.mrb[3].mxu0 }
 0x1de   : > { %v404_v16 = vpop.xlane.xlu0 %403 }
 0x1df   : > { %v405_v17 = vmul.f32 0.0078125, %v404_v16 }
 0x1e1   : > { %v406_v18 = vsub.f32 %v398_v12, %v405_v17 }
 0x1e3   : > { %v407_v19 = vmul.f32 %v406_v18, %v406_v18 }
 0x1e5   : > { %408 = vadd.xlane.f32.xlu0 %v407_v19 }
 0x272   : > { %v409_v20 = vpop.xlane.xlu0 %408 }
 0x273   : > { %v410_v21 = vmul.f32 0.0078125, %v409_v20 }
 0x275   : > { %v411_v22 = vadd.f32 1e-05, %v410_v21 }
 0x277   : > { %691 = vrsqrt.f32 %v411_v22 }
 0x281   : > { %v692_v23 = vpop.eup %691 }
 0x282   : > { %v413_v25 = vmul.f32 %v692_v23, %v406_v18 }
 0x284   : > { %v421_v27 = vmul.f32 %v570_v24, %v413_v25 }
 0x286   : > { %v429_v28 = vadd.f32 %v571_v26, %v421_v27 }
 0x288   : > { %430 = vst [vmem:[%s286_s25] sm:$0xff] %v429_v28 }
 0x289   : > { %764 = shalt.err (!%p761_p1)
}
 0x28a   : > { %s765_s8 = scalar_lea.hbm %s1058_s27, 128  ;;  %s769_s11 = scalar_lea.hbm %s1111_s5, 512 }
 0x28b   : > { %p766_p4 = scmp.ne.s32.totalorder %s1058_s27, %s765_s8  ;;  %p770_p2 = scmp.lt.u32.totalorder %s1058_s27, %s1111_s5 }
 0x28c   : > { %p771_p6 = scmp.lt.u32.totalorder %s769_s11, %s765_s8  ;;  %p773_p10 = scmp.lt.u32.totalorder %s765_s8, %s1058_s27 }
 0x28d   : > { %p767_p5 = pnand %p766_p4, %p1133_p11 }
 0x28e   : > { %p772_p8 = por %p771_p6, %p770_p2 }
 0x28f   : > { %p768_p12 = pneg %p767_p5 }
 0x290   : > { %p774_p13 = por %p773_p10, %p772_p8 }
 0x292   : > { %p775_p0 = pnand %p774_p13, %p768_p12 }
 0x294   : > { %778 = shalt.err (!%p775_p0)
}
 0x295   : > { %611 = dma.vmem_to_hbm [thread:$0]  (%p1133_p11), %s1060_s14, 128, %s1058_s27, %s432_s29  }
 0x296 PF: > { %p628_p9 = scmp.ge.s32.totalorder %s837_s23, 2  ;;  %s459_s25 = sand.u32 1, %s817_s18  }
 0x297   : > { %p1134_p3 = scmp.ne.s32.totalorder %s1122_s6, 0  ;;  %s460_s9 = scalar_lea.sflag [#allocation4], %s459_s25 }
 0x299   : > { %p622_p7 = pnand %p628_p9, %p1134_p3 }
 0x29b   : > { %812 = dma.done.wait (!%p622_p7), %s460_s9, 128  }
 0x29c   : > { %814 = vsyncadd (!%p622_p7), %s460_s9, 4294967168  ;;  %s22_s23 = sadd.s32 1, %s837_s23   ;;  %s1135_s18 = smov %s821_s19 }
 0x29d   : > { %p19_p1 = scmp.ge.s32.totalorder %s22_s23, 6   ;;  %s1136_s19 = smov %s825_s20 }
 0x29e   : > { %s1137_s20 = smov %s995_s13  ;;  %s1138_s21 = smov %s833_s22 }
 0x29f   : > { %s1139_s22 = smov %s1141_s12  ;;  %21 = sbr.rel (!%p19_p1) target bundleno = 7 (0x7), region = 94 }
 0x2a6   :  { %465 = vsyncpa [#allocation3], 1 }
 0x2a7   :  { %467 = vsyncpa [#allocation3 + $0x1], 1 }
 0x2a8   :  { %468 = vsyncpa [#allocation6], 1 }
 0x2a9   :  { %470 = vsyncpa [#allocation6 + $0x1], 1 }
 0x2aa   :  { %471 = vsyncpa [#allocation4], 1 }
 0x2ab   :  { %473 = vsyncpa [#allocation4 + $0x1], 1 }

</bundles_post_ra>
